<compile_context>
chip_gen: v6e
topology: v6e:2x2x1
jax: 0.10.0
libtpu: 0.0.40
codegen_flags: <defaults>
</compile_context>

<pallas_src>
import functools

import jax
import jax.numpy as jnp
from jax.experimental import pallas as pl
from jax.experimental.pallas import tpu as pltpu

LANES = 128
SUBLANES = 8
MAX_TILE_ROWS = 8192          # 8192 x 128 f32 = 4 MiB per input block
CHUNK_ROWS = 128              # inner accumulation chunk: 64 KiB f32 / input (16 vregs)
VMEM_LIMIT_BYTES = 32 * 1024 * 1024


def _round_up(x: int, m: int) -> int:
    return ((x + m - 1) // m) * m


def _pick_tiling(rows_main: int):
    """Pick (tile_rows, chunk_rows): tile_rows multiple of 8 (and of CHUNK_ROWS
    when large), aiming for >= 2 grid steps so v7x's two TensorCores both get
    work, capped at MAX_TILE_ROWS."""
    half = -(-rows_main // 2)
    tile_rows = min(MAX_TILE_ROWS, _round_up(max(half, SUBLANES), SUBLANES))
    if tile_rows >= CHUNK_ROWS:
        tile_rows = (tile_rows // CHUNK_ROWS) * CHUNK_ROWS  # exact inner chunking
        chunk_rows = CHUNK_ROWS
    else:
        chunk_rows = tile_rows
    return tile_rows, chunk_rows


def _rmse_partial_kernel(yh_ref, y_ref, psum_ref, *, rows_valid, needs_mask,
                         chunk_rows):
    # yh_ref, y_ref: VMEM (tile_rows, 128) tiles, native dtype.
    # psum_ref:      VMEM (8, 128) f32 -- per-tile partial sum of (yh - y)^2.
    tile_rows = yh_ref.shape[0]
    n_chunks = tile_rows // chunk_rows
    row_base = pl.program_id(0) * tile_rows

    def tile_sq_sum(masked):
        def body(c, acc):
            start = c * chunk_rows
            if not isinstance(start, int):
                start = pl.multiple_of(start, chunk_rows)
            a = yh_ref[pl.ds(start, chunk_rows), :].astype(jnp.float32)
            b = y_ref[pl.ds(start, chunk_rows), :].astype(jnp.float32)
            d = a - b
            sq = d * d
            if masked:
                # Only the last grid step's block overhangs the array; zero the
                # garbage rows (compare against the TRUE row count).
                local = jax.lax.broadcasted_iota(jnp.int32, sq.shape, 0)
                valid = (row_base + start + local) < rows_valid
                sq = jnp.where(valid, sq, 0.0)
            # Fold chunk_rows -> 8 sublanes with pure VALU vreg adds (no XLU).
            return acc + jnp.sum(
                sq.reshape(chunk_rows // SUBLANES, SUBLANES, LANES), axis=0)

        acc0 = jnp.zeros((SUBLANES, LANES), jnp.float32)
        if n_chunks <= 8:
            acc = acc0
            for c in range(n_chunks):
                acc = body(c, acc)
            return acc
        return jax.lax.fori_loop(0, n_chunks, body, acc0)

    if needs_mask:
        last = pl.num_programs(0) - 1

        @pl.when(pl.program_id(0) == last)
        def _():
            psum_ref[...] = tile_sq_sum(masked=True)

        @pl.when(pl.program_id(0) != last)
        def _():
            psum_ref[...] = tile_sq_sum(masked=False)
    else:
        psum_ref[...] = tile_sq_sum(masked=False)


def rmse_loss(y_hat: jax.Array, y: jax.Array) -> jax.Array:
    assert y_hat.shape == y.shape, "y_hat and y must have the same shape"
    n_true = y_hat.size
    if n_true == 0:
        # torch.mean of an empty tensor is NaN; sqrt(NaN) is NaN.
        return jnp.float32(jnp.nan)

    # reshape(-1) of a contiguous array is a free (bitcast) reshape in XLA.
    yh = y_hat.reshape(-1)
    yy = y.reshape(-1)

    n_main = (n_true // LANES) * LANES          # lane-aligned prefix
    total = jnp.zeros((), jnp.float32)

    if n_main < n_true:
        # < 128 trailing elements: tiny plain-JAX epilogue (no full-array pad).
        th = yh[n_main:].astype(jnp.float32)
        ty = yy[n_main:].astype(jnp.float32)
        total = total + jnp.sum((th - ty) * (th - ty))

    if n_main > 0:
        rows_main = n_main // LANES
        if n_main == n_true:
            yh2 = yh.reshape(rows_main, LANES)  # zero-copy
            yy2 = yy.reshape(rows_main, LANES)
        else:
            # Rare lane-misaligned numel: static prefix slice (may copy once).
            yh2 = yh[:n_main].reshape(rows_main, LANES)
            yy2 = yy[:n_main].reshape(rows_main, LANES)

        tile_rows, chunk_rows = _pick_tiling(rows_main)
        num_tiles = -(-rows_main // tile_rows)
        needs_mask = (num_tiles * tile_rows) != rows_main

        kernel = functools.partial(
            _rmse_partial_kernel, rows_valid=rows_main, needs_mask=needs_mask,
            chunk_rows=chunk_rows)

        partials = pl.pallas_call(
            kernel,
            out_shape=jax.ShapeDtypeStruct((num_tiles * SUBLANES, LANES),
                                           jnp.float32),
            grid=(num_tiles,),
            in_specs=[
                pl.BlockSpec((tile_rows, LANES), lambda i: (i, 0)),
                pl.BlockSpec((tile_rows, LANES), lambda i: (i, 0)),
            ],
            out_specs=pl.BlockSpec((SUBLANES, LANES), lambda i: (i, 0)),
            compiler_params=pltpu.CompilerParams(
                # TODO(synk): if "parallel" is not sharded across v7x's two
                # TensorCores, switch to pltpu.CORE_PARALLEL / pl.core_map.
                dimension_semantics=("parallel",),
                vmem_limit_bytes=VMEM_LIMIT_BYTES,
            ),
        )(yh2, yy2)

        total = total + jnp.sum(partials)

    # Tiny epilogue: sqrt(mean) over the true element count.
    return jnp.sqrt(total / jnp.float32(n_true))


if __name__ == "__main__":
    key = jax.random.PRNGKey(0)
    k1, k2 = jax.random.split(key)

    # Regression-style output (batch=2, C=4, H=W=16): lane-aligned path,
    # 2048 elements -> 16 rows -> 2 grid steps, no masking.
    shape = (2, 4, 16, 16)
    y_hat = jax.random.normal(k1, shape, dtype=jnp.float32)
    y = jax.random.normal(k2, shape, dtype=jnp.float32)

    loss = rmse_loss(y_hat, y)
    jax.block_until_ready(loss)
    ref = jnp.sqrt(jnp.mean((y_hat - y) ** 2))
    assert jnp.allclose(loss, ref, rtol=1e-5, atol=1e-6), (loss, ref)

    # Ragged path: 1500 elements -> 11 full rows (last tile masked) + 92-elem tail.
    k3, k4 = jax.random.split(k2)
    shape2 = (5, 300)
    y_hat2 = jax.random.normal(k3, shape2, dtype=jnp.float32)
    y2 = jax.random.normal(k4, shape2, dtype=jnp.float32)
    loss2 = rmse_loss(y_hat2, y2)
    jax.block_until_ready(loss2)
    ref2 = jnp.sqrt(jnp.mean((y_hat2 - y2) ** 2))
    assert jnp.allclose(loss2, ref2, rtol=1e-5, atol=1e-6), (loss2, ref2)

    print("KERNEL_OK")
</pallas_src>

<mosaic_0001>
module attributes {stable_mosaic.version = 11 : i64} {
  func.func @_rmse_partial_kernel(%arg0: i32, %arg1: memref<8x128xf32, #tpu.memory_space<vmem>>, %arg2: memref<8x128xf32, #tpu.memory_space<vmem>>, %arg3: memref<8x128xf32, #tpu.memory_space<vmem>>) attributes {dimension_semantics = [#tpu.dimension_semantics<parallel>], iteration_bounds = array<i64: 2>, scalar_prefetch = 0 : i64, scratch_operands = 0 : i64, tpu.core_type = #tpu.core_type<tc>, window_params = [{transform_indices = @transform_0, window_bounds = array<i64: 8, 128>}, {transform_indices = @transform_1, window_bounds = array<i64: 8, 128>}, {transform_indices = @transform_2, window_bounds = array<i64: 8, 128>}]} {
    %cst = arith.constant 0.000000e+00 : f32
    %0 = vector.broadcast %cst : f32 to vector<8x128xf32>
    %c0 = arith.constant 0 : index
    %c0_0 = arith.constant 0 : index
    %1 = vector.load %arg1[%c0, %c0_0] : memref<8x128xf32, #tpu.memory_space<vmem>>, vector<8x128xf32>
    %c0_1 = arith.constant 0 : index
    %c0_2 = arith.constant 0 : index
    %2 = vector.load %arg2[%c0_1, %c0_2] : memref<8x128xf32, #tpu.memory_space<vmem>>, vector<8x128xf32>
    %3 = arith.subf %1, %2 : vector<8x128xf32>
    %4 = arith.mulf %3, %3 : vector<8x128xf32>
    %5 = vector.shape_cast %4 : vector<8x128xf32> to vector<1x8x128xf32>
    %cst_3 = arith.constant dense<0.000000e+00> : vector<8x128xf32>
    %6 = vector.multi_reduction <add>, %5, %cst_3 [0] : vector<1x8x128xf32> to vector<8x128xf32>
    %7 = arith.addf %0, %6 : vector<8x128xf32>
    %c0_4 = arith.constant 0 : index
    %c0_5 = arith.constant 0 : index
    %8 = vector.load %arg3[%c0_4, %c0_5] : memref<8x128xf32, #tpu.memory_space<vmem>>, vector<8x128xf32>
    tpu.vector_store %arg3[%c0_4, %c0_5], %7 {strides = array<i32>} : memref<8x128xf32, #tpu.memory_space<vmem>>, vector<8x128xf32>,
    return
  }
  func.func @transform_0(%arg0: i32) -> (i32, i32) {
    %c0_i32 = arith.constant 0 : i32
    %c0_i32_0 = arith.constant 0 : i32
    return %arg0, %c0_i32 : i32, i32
  }
  func.func @transform_1(%arg0: i32) -> (i32, i32) {
    %c0_i32 = arith.constant 0 : i32
    %c0_i32_0 = arith.constant 0 : i32
    return %arg0, %c0_i32 : i32, i32
  }
  func.func @transform_2(%arg0: i32) -> (i32, i32) {
    %c0_i32 = arith.constant 0 : i32
    %c0_i32_0 = arith.constant 0 : i32
    return %arg0, %c0_i32 : i32, i32
  }
}

</mosaic_0001>

<bundles_post_ra>
// kernel: tpu_custom_call.1
= control target key start
LH: loop header
LB: loop body
LE: loop exit
PB: predicated region body
PF: predicated region fallthrough
CT: control target
= control target key end

     0   :  { %7 = vsyncpa [#allocation3], 0  ;;  %s714_s0 = inlined_call_operand.hbm [shape: f32[16,128], index: 0, kind: input, shape index: {}]   ;;  %s715_s1 = inlined_call_operand.hbm [shape: f32[16,128], index: 1, kind: input, shape index: {}]   ;;  %s716_s2 = inlined_call_operand.hbm [shape: f32[16,128], index: 2, kind: output, shape index: {}]  }
   0x1   :  { %9 = vsyncpa [#allocation3 + $0x1], 0 }
   0x2   :  { %10 = vsyncpa [#allocation6], 0 }
   0x3   :  { %12 = vsyncpa [#allocation6 + $0x1], 0 }
   0x4   :  { %13 = vsyncpa [#allocation4], 0 }
   0x5   :  { %15 = vsyncpa [#allocation4 + $0x1], 0  ;;  %s520_s9 = smov 0   ;;  %s522_s10 = smov 0  }
   0x6   :  { %s524_s11 = smov 0   ;;  %s526_s12 = smov 0  }
   0x7 LB: > { %s541_s13 = sadd.s32 4294967295, %s500_s12   ;;  %s310_s14 = sadd.s32 4294967294, %s500_s12   ;;  %s500_s12 = sphi %s526_s12, %s735_s12   ;;  %s496_s11 = sphi %s524_s11, %s734_s11   ;;  %s492_s10 = sphi %s522_s10, %s733_s10   ;;  %s488_s9 = sphi %s520_s9, %s732_s9  }
   0x8   : > { %s545_s15 = sadd.s32 1, %s500_s12   ;;  %s28_s16 = sadd.s32 1, %s496_s11 }
   0x9   : > { %s25_s17 = ssub.s32 %s500_s12, %s545_s15  ;;  %p35_p0 = scmp.ne.s32.totalorder %s496_s11, %s492_s10 }
   0xa   : > { %p26_p1 = scmp.eq.s32.totalorder %s25_s17, 0  ;;  %p36_p2 = scmp.eq.s32.totalorder %s500_s12, 0 }
   0xb   : > { %p41_p3 = scmp.ne.s32.totalorder %s492_s10, %s488_s9  ;;  %p42_p4 = scmp.eq.s32.totalorder %s541_s13, 0 }
   0xc   : > { %s557_s18 = scalar_select %p26_p1, %s496_s11, %s28_s16  }
   0xd   : > { %p559_p5 = por %p36_p2, %p35_p0  ;;  %p563_p6 = por %p42_p4, %p41_p3 }
   0xe   : > { %p91_p7 = scmp.eq.s32.totalorder %s541_s13, 1  ;;  %p97_p8 = scmp.eq.s32.totalorder %s310_s14, 1 }
   0xf   : > { %s720_s20 = scalar_select %p563_p6, 1, 0 }
  0x10   : > { %p342_p10 = scmp.lt.s32.totalorder %s500_s12, 2  ;;  %p570_p11 = por %p91_p7, %p35_p0 }
  0x11   : > { %p574_p12 = por %p97_p8, %p41_p3  ;;  %s579_s23 = sand.u32 1, %s496_s11  }
  0x12   : > { %s721_s21 = scalar_select %p570_p11, 1, 0 }
  0x13   : > { %s722_s22 = scalar_select %p574_p12, 1, 0 }
  0x14   : > { %s314_s24 = sshll.u32 %s500_s12, 7  ;;  %s313_s25 = sshll.u32 %s579_s23, 3 }
  0x15   : > { %s588_s28 = scalar_lea.hbm %s714_s0, %s314_s24  ;;  %s121_s29 = scalar_lea.vmem [#allocation2], %s313_s25 }
  0x16   : > { %s128_s30 = sshll.u32 %s121_s29, 4  ;;  %p594_p13 = pnand %p342_p10, %p559_p5  ;;  %s598_s30 = int_to_ptr.vmem [resolvable:$true] %s128_s30 }
  0x17   : > { %s118_s4 = scalar_lea.sflag [#allocation3], %s579_s23  ;;  %s376_s5 = scalar_lea.hbm %s588_s28, 128 }
  0x18   : > { %p377_p2 = scmp.ne.s32.totalorder %s588_s28, %s376_s5  ;;  %p378_p3 = pneg %p594_p13 }
  0x19   : > { %s381_s8 = scalar_lea.hbm %s714_s0, 256  ;;  %p382_p5 = scmp.lt.s32.totalorder %s588_s28, %s714_s0 }
  0x1a   : > { %p379_p4 = pnand %p378_p3, %p377_p2  ;;  %p383_p8 = scmp.lt.s32.totalorder %s381_s8, %s376_s5 }
  0x1c   : > { %p380_p7 = pneg %p379_p4  ;;  %p384_p10 = por %p383_p8, %p382_p5 }
  0x1e   : > { %p385_p9 = pnand %p384_p10, %p380_p7 }
  0x20   : > { %388 = shalt.err (!%p385_p9)
}
  0x21   : > { %s389_s17 = scalar_lea.vmem %s598_s30, 128  ;;  %s502_s19 = smov [#allocation2]  }
  0x22   : > { %p390_p0 = scmp.ne.s32.totalorder %s598_s30, %s389_s17  ;;  %s394_s26 = sshll.u32 %s502_s19, 4  ;;  %s395_s26 = int_to_ptr.vmem [resolvable:$false] %s394_s26 }
  0x23   : > { %s396_s27 = scalar_lea.vmem %s395_s26, 256  ;;  %p397_p1 = scmp.lt.s32.totalorder %s598_s30, %s395_s26 }
  0x24   : > { %p392_p2 = pnand %p390_p0, %p378_p3  ;;  %p398_p12 = scmp.lt.s32.totalorder %s396_s27, %s389_s17 }
  0x26   : > { %p393_p4 = pneg %p392_p2  ;;  %p399_p11 = por %p398_p12, %p397_p1 }
  0x28   : > { %p400_p5 = pnand %p399_p11, %p393_p4 }
  0x2a   : > { %403 = shalt.err (!%p400_p5)
}
  0x2b   : > { %334 = dma.hbm_to_vmem [thread:$0]  (!%p594_p13), %s588_s28, 128, %s598_s30, %s118_s4  }
  0x2c   : > { %p724_p9 = scmp.lt.s32.totalorder %s500_s12, 3  ;;  %p725_p0 = scmp.ge.s32.totalorder %s500_s12, 1 }
  0x2d   : > { %s640_s7 = scalar_lea.hbm %s715_s1, %s314_s24  ;;  %s139_s8 = scalar_lea.vmem [#allocation5], %s313_s25 }
  0x2e   : > { %p631_p7 = pnand %p725_p0, %p724_p9  ;;  %s146_s14 = sshll.u32 %s139_s8, 4  ;;  %s147_s14 = int_to_ptr.vmem [resolvable:$true] %s146_s14 }
  0x2f   : > { %s136_s28 = scalar_lea.sflag [#allocation6], %s579_s23  ;;  %s404_s30 = scalar_lea.hbm %s640_s7, 128 }
  0x30   : > { %s726_s29 = scalar_select %p631_p7, 1, 0 }
  0x31   : > { %p405_p11 = scmp.ne.s32.totalorder %s640_s7, %s404_s30  ;;  %s409_s17 = scalar_lea.hbm %s715_s1, 256 }
  0x32   : > { %p410_p8 = scmp.lt.s32.totalorder %s640_s7, %s715_s1  ;;  %p411_p10 = scmp.lt.s32.totalorder %s409_s17, %s404_s30 }
  0x33   : > { %p407_p12 = pnand %p405_p11, %p378_p3 }
  0x34   : > { %p412_p2 = por %p411_p10, %p410_p8 }
  0x35   : > { %p408_p1 = pneg %p407_p12 }
  0x37   : > { %p413_p4 = pnand %p412_p2, %p408_p1 }
  0x39   : > { %416 = shalt.err (!%p413_p4)
}
  0x3a   : > { %s417_s25 = scalar_lea.vmem %s147_s14, 128  ;;  %s503_s23 = smov [#allocation5]  }
  0x3b   : > { %p418_p5 = scmp.ne.s32.totalorder %s147_s14, %s417_s25  ;;  %s422_s26 = sshll.u32 %s503_s23, 4  ;;  %s423_s26 = int_to_ptr.vmem [resolvable:$false] %s422_s26 }
  0x3c   : > { %s424_s27 = scalar_lea.vmem %s423_s26, 256  ;;  %p425_p11 = scmp.lt.s32.totalorder %s147_s14, %s423_s26 }
  0x3d   : > { %p420_p9 = pnand %p418_p5, %p378_p3  ;;  %p426_p12 = scmp.lt.s32.totalorder %s424_s27, %s417_s25 }
  0x3f   : > { %p421_p0 = pneg %p420_p9  ;;  %p427_p6 = por %p426_p12, %p425_p11 }
  0x41   : > { %p428_p7 = pnand %p427_p6, %p421_p0 }
  0x43   : > { %431 = shalt.err (!%p428_p7)
}
  0x44   : > { %337 = dma.hbm_to_vmem [thread:$0]  (!%p594_p13), %s640_s7, 128, %s147_s14, %s136_s28  }
  0x45   : > { %p727_p1 = scmp.ne.s32.totalorder %s726_s29, 0 }
  0x46   : > { %s666_s5 = sand.u32 (!%p727_p1), 1, %s492_s10   ;;  %p728_p3 = scmp.ne.s32.totalorder (!%p727_p1), %s720_s20, 0 }
  0x47   : > { %155 = sbr.rel (%p727_p1) target bundleno = 104 (0x68), region = 28  ;;  %s318_s6 = sshll.u32 (!%p727_p1), %s666_s5, 3 }
  0x48   : > { %s158_s8 = scalar_lea.sflag (!%p727_p1), [#allocation3], %s666_s5  ;;  %s161_s30 = scalar_lea.vmem (!%p727_p1), [#allocation2], %s318_s6 }
  0x4c   : > { %475 = dma.done.wait (%p728_p3), %s158_s8, 128  }
  0x4d   : > { %477 = vsyncadd (%p728_p3), %s158_s8, 4294967168  ;;  %s167_s3 = scalar_lea.sflag [#allocation6], %s666_s5  ;;  %s170_s7 = scalar_lea.vmem [#allocation5], %s318_s6 }
  0x4e   : > { %479 = dma.done.wait (%p728_p3), %s167_s3, 128  }
  0x4f   : > { %481 = vsyncadd (%p728_p3), %s167_s3, 4294967168  ;;  %v196_v0 = vld [vmem:[%s161_s30] sm:$0xff]  ;;  %v197_v1 = vld [vmem:[%s170_s7] sm:$0xff]  ;;  %s195_s29 = scalar_lea.vmem [#allocation7], %s318_s6  ;;  %s322_s28 = sshll.u32 %s541_s13, 7 }
  0x50   : > { %s217_s14 = sshll.u32 %s195_s29, 4  ;;  %v198_v2 = vsub.f32 %v196_v0, %v197_v1  ;;  %s215_s17 = scalar_lea.hbm %s716_s2, %s322_s28  ;;  %s218_s14 = int_to_ptr.vmem [resolvable:$true] %s217_s14 }
  0x51   : > { %s204_s24 = scalar_lea.sflag [#allocation4], %s666_s5  ;;  %s432_s19 = scalar_lea.vmem %s218_s14, 128 }
  0x52   : > { %v199_v3 = vmul.f32 %v198_v2, %v198_v2  ;;  %p433_p6 = scmp.ne.s32.totalorder %s218_s14, %s432_s19  ;;  %p729_p13 = scmp.ne.s32.totalorder %s721_s21, 0 }
  0x53   : > { %s504_s20 = smov [#allocation7]  }
  0x54   : > { %202 = vst [vmem:[%s195_s29] sm:$0xff] %v199_v3  ;;  %p434_p7 = pnand %p433_p6, %p729_p13  ;;  %s436_s25 = sshll.u32 %s504_s20, 4  ;;  %s437_s25 = int_to_ptr.vmem [resolvable:$false] %s436_s25 }
  0x55   : > { %s438_s23 = scalar_lea.vmem %s437_s25, 256  ;;  %p439_p10 = scmp.lt.s32.totalorder %s218_s14, %s437_s25 }
  0x56   : > { %p435_p8 = pneg %p434_p7  ;;  %p440_p2 = scmp.lt.s32.totalorder %s438_s23, %s432_s19 }
  0x58   : > { %p441_p4 = por %p440_p2, %p439_p10 }
  0x5a   : > { %p442_p5 = pnand %p441_p4, %p435_p8 }
  0x5c   : > { %445 = shalt.err (!%p442_p5)
}
  0x5d   : > { %s446_s13 = scalar_lea.hbm %s215_s17, 128  ;;  %s450_s5 = scalar_lea.hbm %s716_s2, 256 }
  0x5e   : > { %p447_p9 = scmp.ne.s32.totalorder %s215_s17, %s446_s13  ;;  %p451_p12 = scmp.lt.s32.totalorder %s215_s17, %s716_s2 }
  0x5f   : > { %p452_p1 = scmp.lt.s32.totalorder %s450_s5, %s446_s13 }
  0x60   : > { %p448_p0 = pnand %p447_p9, %p729_p13 }
  0x61   : > { %p453_p3 = por %p452_p1, %p451_p12 }
  0x62   : > { %p449_p11 = pneg %p448_p0 }
  0x64   : > { %p454_p6 = pnand %p453_p3, %p449_p11 }
  0x66   : > { %457 = shalt.err (!%p454_p6)
}
  0x67   : > { %329 = dma.vmem_to_hbm [thread:$0]  (%p729_p13), %s218_s14, 128, %s215_s17, %s204_s24  }
  0x68 PF: > { %s229_s30 = sand.u32 1, %s488_s9   ;;  %p730_p7 = scmp.ne.s32.totalorder %s722_s22, 0 }
  0x69   : > { %p731_p8 = scmp.ge.s32.totalorder %s500_s12, 2  ;;  %s230_s3 = scalar_lea.sflag [#allocation4], %s229_s30 }
  0x6b   : > { %p339_p10 = pnand %p731_p8, %p730_p7 }
  0x6d   : > { %p340_p2 = pneg %p339_p10 }
  0x6f   : > { %483 = dma.done.wait (%p340_p2), %s230_s3, 128  }
  0x70   : > { %485 = vsyncadd (%p340_p2), %s230_s3, 4294967168  ;;  %p18_p4 = scmp.ge.s32.totalorder %s545_s15, 4   ;;  %s732_s9 = smov %s492_s10 }
  0x71   : > { %s733_s10 = smov %s496_s11  ;;  %s734_s11 = smov %s557_s18 }
  0x72   : > { %s735_s12 = smov %s545_s15  ;;  %20 = sbr.rel (!%p18_p4) target bundleno = 7 (0x7), region = 86 }
  0x77   :  { %235 = vsyncpa [#allocation3], 1 }
  0x78   :  { %237 = vsyncpa [#allocation3 + $0x1], 1 }
  0x79   :  { %238 = vsyncpa [#allocation6], 1 }
  0x7a   :  { %240 = vsyncpa [#allocation6 + $0x1], 1 }
  0x7b   :  { %241 = vsyncpa [#allocation4], 1 }
  0x7c   :  { %243 = vsyncpa [#allocation4 + $0x1], 1 }

</bundles_post_ra>
